<compile_context>
chip_gen: v7x
topology: tpu7x:2x2x1
jax: 0.10.0
libtpu: 0.0.40
codegen_flags: <defaults>
</compile_context>

<pallas_src>
import jax
import jax.numpy as jnp
from jax import lax
from jax.experimental import pallas as pl
from jax.experimental.pallas import tpu as pltpu


def ranknet_kernel(n_ref, w_ref, x_ref, out_ref):
    # n_ref  : (1,)      int32 SMEM  -- true number of documents (1 <= n <= 8*L)
    # w_ref  : (18,)     f32   SMEM  -- [W1 (3,3) | W2 (1,3) | W3 (2,2) | W4 (1,2)], row-major
    # x_ref  : (4, 8, L) f32   VMEM  -- feature-major; doc index = sublane*L + lane
    # out_ref: (8, L)    f32   VMEM  -- softmax scores, same doc packing (lane-dense stores)
    x0 = x_ref[0]
    x1 = x_ref[1]
    x2 = x_ref[2]
    pr = x_ref[3]

    # tf_idf_score = relu(tf_idf_sum_inner(raw_tf_idf))                    (3 hidden rows)
    h0 = jnp.maximum(x0 * w_ref[0] + x1 * w_ref[1] + x2 * w_ref[2], 0.0)
    h1 = jnp.maximum(x0 * w_ref[3] + x1 * w_ref[4] + x2 * w_ref[5], 0.0)
    h2 = jnp.maximum(x0 * w_ref[6] + x1 * w_ref[7] + x2 * w_ref[8], 0.0)

    # tf_idf_score = relu(tf_idf_sum(h) + raw_tf_idf[:, 0])
    t = jnp.maximum(h0 * w_ref[9] + h1 * w_ref[10] + h2 * w_ref[11] + x0, 0.0)

    # methods_score = [t, page_rank]; s = relu(method_sum_inner(methods_score))
    s0 = jnp.maximum(t * w_ref[12] + pr * w_ref[13], 0.0)
    s1 = jnp.maximum(t * w_ref[14] + pr * w_ref[15], 0.0)

    # score = relu(method_sum(s) + methods_score[:, 0]) * 1000
    sc = jnp.maximum(s0 * w_ref[16] + s1 * w_ref[17] + t, 0.0) * 1000.0    # (8, L)

    # Softmax over documents (both sublane and lane axes); padding masked exactly once.
    n = n_ref[0]
    L = sc.shape[1]
    doc = (lax.broadcasted_iota(jnp.int32, sc.shape, 0) * L
           + lax.broadcasted_iota(jnp.int32, sc.shape, 1))
    sc = jnp.where(doc < n, sc, jnp.float32(-1e30))
    m = jnp.max(jnp.max(sc, axis=1, keepdims=True), axis=0, keepdims=True)      # (1, 1)
    e = jnp.exp(sc - m)                              # padded docs underflow to exactly 0
    denom = jnp.sum(jnp.sum(e, axis=1, keepdims=True), axis=0, keepdims=True)   # (1, 1)
    # EUP approx reciprocal + one Newton refinement on the (1,1) denominator:
    # ~f32-accurate (rel err ~ (2^-12)^2), no VALU divide.
    inv = pl.reciprocal(denom, approx=True)
    inv = inv * (2.0 - denom * inv)
    out_ref[...] = e * inv


@jax.jit
def ranknet_forward(raw_tf_idf, page_rank, w1, w2, w3, w4):
    """w1:(3,3), w2:(1,3), w3:(2,2), w4:(1,2) -- PyTorch nn.Linear (out, in), bias=False."""
    n = raw_tf_idf.shape[0]
    assert n >= 1, "softmax over an empty document set is undefined"
    n_pad = pl.cdiv(n, 1024) * 1024       # multiple of 8*128 so docs fill (sublane, lane)
    L = n_pad // 8

    # Fused, doc-packed slab (4, 8, L).  Under the surrounding jit, transpose/concat/pad/reshape
    # fuse into ~one copy over the input instead of several materializing HBM passes.
    x = jnp.concatenate(
        [raw_tf_idf.astype(jnp.float32).T, page_rank.astype(jnp.float32).T], axis=0
    )                                     # (4, N)
    x = jnp.pad(x, ((0, 0), (0, n_pad - n))).reshape(4, 8, L)

    # All weights flattened row-major into one 1-D SMEM array (18 scalars -> 128 B padded).
    w_flat = jnp.concatenate(
        [w1.reshape(-1), w2.reshape(-1), w3.reshape(-1), w4.reshape(-1)]
    ).astype(jnp.float32)                 # (18,)
    n_arr = jnp.array([n], dtype=jnp.int32)

    out = pl.pallas_call(
        ranknet_kernel,
        out_shape=jax.ShapeDtypeStruct((8, L), jnp.float32),
        in_specs=[
            pl.BlockSpec(memory_space=pltpu.MemorySpace.SMEM),   # n       (1,)      int32
            pl.BlockSpec(memory_space=pltpu.MemorySpace.SMEM),   # weights (18,)     f32
            pl.BlockSpec(memory_space=pltpu.MemorySpace.VMEM),   # x       (4, 8, L) f32
        ],
        out_specs=pl.BlockSpec(memory_space=pltpu.MemorySpace.VMEM),
        # 32 MiB: equal to the scoped default on v6e/v7x (comfortable headroom under v7x's
        # 64 MiB physical VMEM), a raise over v5e's 16 MiB default for large candidate sets.
        compiler_params=pltpu.CompilerParams(vmem_limit_bytes=32 * 1024 * 1024),
    )(n_arr, w_flat, x)
    # doc = sublane*L + lane  ==  row-major flatten of (8, L)
    return out.reshape(-1)[:n]            # (N,)


def ranknet_reference(raw, pr, w1, w2, w3, w4):
    """Pure-JAX replica of the PyTorch forward, for correctness checking."""
    h = jax.nn.relu(raw @ w1.T)                                   # (N,3)
    t = jax.nn.relu((h @ w2.T).reshape(-1) + raw[:, 0])[:, None]  # (N,1)
    m = jnp.concatenate([t, pr], axis=1)                          # (N,2)
    s = jax.nn.relu(m @ w3.T)                                     # (N,2)
    s = jax.nn.relu(s @ w4.T + m[:, 0:1])                         # (N,1)
    sc = s[:, 0] * 1000.0
    return jax.nn.softmax(sc, axis=0)


if __name__ == "__main__":
    key = jax.random.PRNGKey(0)
    _, _, k1, k2, k3, k4 = jax.random.split(key, 6)

    # Deterministic synthetic parameters (PyTorch nn.Linear shapes: (out_features, in_features)).
    w1 = jax.random.normal(k1, (3, 3), jnp.float32) * 0.3  # tf_idf_sum_inner
    w2 = jax.random.normal(k2, (1, 3), jnp.float32) * 0.3  # tf_idf_sum
    w3 = jax.random.normal(k3, (2, 2), jnp.float32) * 0.3  # method_sum_inner
    w4 = jax.random.normal(k4, (1, 2), jnp.float32) * 0.3  # method_sum

    # N=8: heavy padding inside one (8,128) tile; N=300: partial sublane rows + masking;
    # N=1500: multiple lane tiles (L=256).
    for n in (8, 300, 1500):
        k_raw, k_pr = jax.random.split(jax.random.fold_in(key, n))
        # Small magnitudes so the *1000 softmax is not fully saturated.
        raw_tf_idf = jax.random.uniform(k_raw, (n, 3), jnp.float32) * 2e-3
        page_rank = jax.random.uniform(k_pr, (n, 1), jnp.float32) * 2e-3

        out = jax.block_until_ready(
            ranknet_forward(raw_tf_idf, page_rank, w1, w2, w3, w4)
        )
        ref = ranknet_reference(raw_tf_idf, page_rank, w1, w2, w3, w4)

        assert out.shape == (n,)
        assert jnp.allclose(out, ref, atol=1e-5, rtol=1e-4), (n, out, ref)
        assert jnp.allclose(jnp.sum(out), 1.0, atol=1e-5)

    print("KERNEL_OK")
</pallas_src>

<mosaic_0001>
module attributes {stable_mosaic.version = 11 : i64} {
  func.func @ranknet_kernel(%arg0: memref<1xi32, #tpu.memory_space<smem>>, %arg1: memref<18xf32, #tpu.memory_space<smem>>, %arg2: memref<4x8x128xf32, #tpu.memory_space<vmem>>, %arg3: memref<8x128xf32, #tpu.memory_space<vmem>>) attributes {dimension_semantics = [], scalar_prefetch = 0 : i64, scratch_operands = 0 : i64, tpu.core_type = #tpu.core_type<tc>} {
    %c0 = arith.constant 0 : index
    %c0_0 = arith.constant 0 : index
    %c0_1 = arith.constant 0 : index
    %0 = vector.load %arg2[%c0, %c0_0, %c0_1] : memref<4x8x128xf32, #tpu.memory_space<vmem>>, vector<1x8x128xf32>
    %1 = vector.shape_cast %0 : vector<1x8x128xf32> to vector<8x128xf32>
    %c1 = arith.constant 1 : index
    %c0_2 = arith.constant 0 : index
    %c0_3 = arith.constant 0 : index
    %2 = vector.load %arg2[%c1, %c0_2, %c0_3] : memref<4x8x128xf32, #tpu.memory_space<vmem>>, vector<1x8x128xf32>
    %3 = vector.shape_cast %2 : vector<1x8x128xf32> to vector<8x128xf32>
    %c2 = arith.constant 2 : index
    %c0_4 = arith.constant 0 : index
    %c0_5 = arith.constant 0 : index
    %4 = vector.load %arg2[%c2, %c0_4, %c0_5] : memref<4x8x128xf32, #tpu.memory_space<vmem>>, vector<1x8x128xf32>
    %5 = vector.shape_cast %4 : vector<1x8x128xf32> to vector<8x128xf32>
    %c3 = arith.constant 3 : index
    %c0_6 = arith.constant 0 : index
    %c0_7 = arith.constant 0 : index
    %6 = vector.load %arg2[%c3, %c0_6, %c0_7] : memref<4x8x128xf32, #tpu.memory_space<vmem>>, vector<1x8x128xf32>
    %7 = vector.shape_cast %6 : vector<1x8x128xf32> to vector<8x128xf32>
    %c0_8 = arith.constant 0 : index
    %8 = memref.load %arg1[%c0_8] : memref<18xf32, #tpu.memory_space<smem>>
    %9 = vector.broadcast %8 : f32 to vector<8x128xf32>
    %10 = arith.mulf %1, %9 : vector<8x128xf32>
    %c1_9 = arith.constant 1 : index
    %11 = memref.load %arg1[%c1_9] : memref<18xf32, #tpu.memory_space<smem>>
    %12 = vector.broadcast %11 : f32 to vector<8x128xf32>
    %13 = arith.mulf %3, %12 : vector<8x128xf32>
    %14 = arith.addf %10, %13 : vector<8x128xf32>
    %c2_10 = arith.constant 2 : index
    %15 = memref.load %arg1[%c2_10] : memref<18xf32, #tpu.memory_space<smem>>
    %16 = vector.broadcast %15 : f32 to vector<8x128xf32>
    %17 = arith.mulf %5, %16 : vector<8x128xf32>
    %18 = arith.addf %14, %17 : vector<8x128xf32>
    %cst = arith.constant 0.000000e+00 : f32
    %19 = vector.broadcast %cst : f32 to vector<8x128xf32>
    %20 = arith.maximumf %18, %19 : vector<8x128xf32>
    %c3_11 = arith.constant 3 : index
    %21 = memref.load %arg1[%c3_11] : memref<18xf32, #tpu.memory_space<smem>>
    %22 = vector.broadcast %21 : f32 to vector<8x128xf32>
    %23 = arith.mulf %1, %22 : vector<8x128xf32>
    %c4 = arith.constant 4 : index
    %24 = memref.load %arg1[%c4] : memref<18xf32, #tpu.memory_space<smem>>
    %25 = vector.broadcast %24 : f32 to vector<8x128xf32>
    %26 = arith.mulf %3, %25 : vector<8x128xf32>
    %27 = arith.addf %23, %26 : vector<8x128xf32>
    %c5 = arith.constant 5 : index
    %28 = memref.load %arg1[%c5] : memref<18xf32, #tpu.memory_space<smem>>
    %29 = vector.broadcast %28 : f32 to vector<8x128xf32>
    %30 = arith.mulf %5, %29 : vector<8x128xf32>
    %31 = arith.addf %27, %30 : vector<8x128xf32>
    %cst_12 = arith.constant 0.000000e+00 : f32
    %32 = vector.broadcast %cst_12 : f32 to vector<8x128xf32>
    %33 = arith.maximumf %31, %32 : vector<8x128xf32>
    %c6 = arith.constant 6 : index
    %34 = memref.load %arg1[%c6] : memref<18xf32, #tpu.memory_space<smem>>
    %35 = vector.broadcast %34 : f32 to vector<8x128xf32>
    %36 = arith.mulf %1, %35 : vector<8x128xf32>
    %c7 = arith.constant 7 : index
    %37 = memref.load %arg1[%c7] : memref<18xf32, #tpu.memory_space<smem>>
    %38 = vector.broadcast %37 : f32 to vector<8x128xf32>
    %39 = arith.mulf %3, %38 : vector<8x128xf32>
    %40 = arith.addf %36, %39 : vector<8x128xf32>
    %c8 = arith.constant 8 : index
    %41 = memref.load %arg1[%c8] : memref<18xf32, #tpu.memory_space<smem>>
    %42 = vector.broadcast %41 : f32 to vector<8x128xf32>
    %43 = arith.mulf %5, %42 : vector<8x128xf32>
    %44 = arith.addf %40, %43 : vector<8x128xf32>
    %cst_13 = arith.constant 0.000000e+00 : f32
    %45 = vector.broadcast %cst_13 : f32 to vector<8x128xf32>
    %46 = arith.maximumf %44, %45 : vector<8x128xf32>
    %c9 = arith.constant 9 : index
    %47 = memref.load %arg1[%c9] : memref<18xf32, #tpu.memory_space<smem>>
    %48 = vector.broadcast %47 : f32 to vector<8x128xf32>
    %49 = arith.mulf %20, %48 : vector<8x128xf32>
    %c10 = arith.constant 10 : index
    %50 = memref.load %arg1[%c10] : memref<18xf32, #tpu.memory_space<smem>>
    %51 = vector.broadcast %50 : f32 to vector<8x128xf32>
    %52 = arith.mulf %33, %51 : vector<8x128xf32>
    %53 = arith.addf %49, %52 : vector<8x128xf32>
    %c11 = arith.constant 11 : index
    %54 = memref.load %arg1[%c11] : memref<18xf32, #tpu.memory_space<smem>>
    %55 = vector.broadcast %54 : f32 to vector<8x128xf32>
    %56 = arith.mulf %46, %55 : vector<8x128xf32>
    %57 = arith.addf %53, %56 : vector<8x128xf32>
    %58 = arith.addf %57, %1 : vector<8x128xf32>
    %cst_14 = arith.constant 0.000000e+00 : f32
    %59 = vector.broadcast %cst_14 : f32 to vector<8x128xf32>
    %60 = arith.maximumf %58, %59 : vector<8x128xf32>
    %c12 = arith.constant 12 : index
    %61 = memref.load %arg1[%c12] : memref<18xf32, #tpu.memory_space<smem>>
    %62 = vector.broadcast %61 : f32 to vector<8x128xf32>
    %63 = arith.mulf %60, %62 : vector<8x128xf32>
    %c13 = arith.constant 13 : index
    %64 = memref.load %arg1[%c13] : memref<18xf32, #tpu.memory_space<smem>>
    %65 = vector.broadcast %64 : f32 to vector<8x128xf32>
    %66 = arith.mulf %7, %65 : vector<8x128xf32>
    %67 = arith.addf %63, %66 : vector<8x128xf32>
    %cst_15 = arith.constant 0.000000e+00 : f32
    %68 = vector.broadcast %cst_15 : f32 to vector<8x128xf32>
    %69 = arith.maximumf %67, %68 : vector<8x128xf32>
    %c14 = arith.constant 14 : index
    %70 = memref.load %arg1[%c14] : memref<18xf32, #tpu.memory_space<smem>>
    %71 = vector.broadcast %70 : f32 to vector<8x128xf32>
    %72 = arith.mulf %60, %71 : vector<8x128xf32>
    %c15 = arith.constant 15 : index
    %73 = memref.load %arg1[%c15] : memref<18xf32, #tpu.memory_space<smem>>
    %74 = vector.broadcast %73 : f32 to vector<8x128xf32>
    %75 = arith.mulf %7, %74 : vector<8x128xf32>
    %76 = arith.addf %72, %75 : vector<8x128xf32>
    %cst_16 = arith.constant 0.000000e+00 : f32
    %77 = vector.broadcast %cst_16 : f32 to vector<8x128xf32>
    %78 = arith.maximumf %76, %77 : vector<8x128xf32>
    %c16 = arith.constant 16 : index
    %79 = memref.load %arg1[%c16] : memref<18xf32, #tpu.memory_space<smem>>
    %80 = vector.broadcast %79 : f32 to vector<8x128xf32>
    %81 = arith.mulf %69, %80 : vector<8x128xf32>
    %c17 = arith.constant 17 : index
    %82 = memref.load %arg1[%c17] : memref<18xf32, #tpu.memory_space<smem>>
    %83 = vector.broadcast %82 : f32 to vector<8x128xf32>
    %84 = arith.mulf %78, %83 : vector<8x128xf32>
    %85 = arith.addf %81, %84 : vector<8x128xf32>
    %86 = arith.addf %85, %60 : vector<8x128xf32>
    %cst_17 = arith.constant 0.000000e+00 : f32
    %87 = vector.broadcast %cst_17 : f32 to vector<8x128xf32>
    %88 = arith.maximumf %86, %87 : vector<8x128xf32>
    %cst_18 = arith.constant 1.000000e+03 : f32
    %89 = vector.broadcast %cst_18 : f32 to vector<8x128xf32>
    %90 = arith.mulf %88, %89 : vector<8x128xf32>
    %c0_19 = arith.constant 0 : index
    %91 = memref.load %arg0[%c0_19] : memref<1xi32, #tpu.memory_space<smem>>
    %92 = tpu.iota {dimensions = array<i32: 0>} : vector<8x128xi32>
    %c128_i32 = arith.constant 128 : i32
    %93 = vector.broadcast %c128_i32 : i32 to vector<8x128xi32>
    %94 = arith.muli %92, %93 : vector<8x128xi32>
    %95 = tpu.iota {dimensions = array<i32: 1>} : vector<8x128xi32>
    %96 = arith.addi %94, %95 : vector<8x128xi32>
    %97 = vector.broadcast %91 : i32 to vector<8x128xi32>
    %98 = arith.cmpi slt, %96, %97 : vector<8x128xi32>
    %cst_20 = arith.constant -1.000000e+30 : f32
    %99 = vector.broadcast %cst_20 : f32 to vector<8x128xf32>
    %100 = arith.select %98, %90, %99 : vector<8x128xi1>, vector<8x128xf32>
    %cst_21 = arith.constant dense<0xFF800000> : vector<8xf32>
    %101 = vector.multi_reduction <maximumf>, %100, %cst_21 [1] : vector<8x128xf32> to vector<8xf32>
    %102 = vector.shape_cast %101 : vector<8xf32> to vector<8x1xf32>
    %cst_22 = arith.constant dense<0xFF800000> : vector<1xf32>
    %103 = vector.multi_reduction <maximumf>, %102, %cst_22 [0] : vector<8x1xf32> to vector<1xf32>
    %104 = vector.shape_cast %103 : vector<1xf32> to vector<1x1xf32>
    %105 = vector.broadcast %104 : vector<1x1xf32> to vector<8x128xf32>
    %106 = arith.subf %100, %105 : vector<8x128xf32>
    %107 = math.exp %106 : vector<8x128xf32>
    %cst_23 = arith.constant dense<0.000000e+00> : vector<8xf32>
    %108 = vector.multi_reduction <add>, %107, %cst_23 [1] : vector<8x128xf32> to vector<8xf32>
    %109 = vector.shape_cast %108 : vector<8xf32> to vector<8x1xf32>
    %cst_24 = arith.constant dense<0.000000e+00> : vector<1xf32>
    %110 = vector.multi_reduction <add>, %109, %cst_24 [0] : vector<8x1xf32> to vector<1xf32>
    %111 = vector.shape_cast %110 : vector<1xf32> to vector<1x1xf32>
    %112 = tpu.reciprocal %111 {approx = true} : vector<1x1xf32> -> vector<1x1xf32>
    %113 = arith.mulf %111, %112 : vector<1x1xf32>
    %cst_25 = arith.constant 2.000000e+00 : f32
    %114 = vector.broadcast %cst_25 : f32 to vector<1x1xf32>
    %115 = arith.subf %114, %113 : vector<1x1xf32>
    %116 = arith.mulf %112, %115 : vector<1x1xf32>
    %117 = vector.broadcast %116 : vector<1x1xf32> to vector<8x128xf32>
    %118 = arith.mulf %107, %117 : vector<8x128xf32>
    %c0_26 = arith.constant 0 : index
    %c0_27 = arith.constant 0 : index
    %119 = vector.load %arg3[%c0_26, %c0_27] : memref<8x128xf32, #tpu.memory_space<vmem>>, vector<8x128xf32>
    tpu.vector_store %arg3[%c0_26, %c0_27], %118 {strides = array<i32>} : memref<8x128xf32, #tpu.memory_space<vmem>>, vector<8x128xf32>,
    return
  }
}

</mosaic_0001>

<bundles_post_ra>
// kernel: ranknet_forward.1
= control target key start
LH: loop header
LB: loop body
LE: loop exit
PB: predicated region body
PF: predicated region fallthrough
CT: control target
= control target key end

     0   :  { %9 = vsyncpa [#allocation4], 0  ;;  %s237_s0 = inlined_call_operand.<no memory space> [shape: s32[1], index: 0, kind: input, shape index: {}]   ;;  %s238_s1 = inlined_call_operand.vmem [shape: f32[18], index: 1, kind: input, shape index: {}]   ;;  %s239_s2 = inlined_call_operand.vmem [shape: f32[4,8,128], index: 2, kind: input, shape index: {}]   ;;  %s240_s3 = inlined_call_operand.vmem [shape: f32[8,128], index: 3, kind: output, shape index: {}]  }
   0x1   :  { %s18_s14 = sshll.u32 %s238_s1, 4  ;;  %s19_s14 = int_to_ptr.vmem [resolvable:$true] %s18_s14 }
   0x2   :  { %s175_s15 = scalar_lea.vmem %s19_s14, 16  ;;  %p180_p1 = scmp.lt.s32.totalorder %s19_s14, %s19_s14 }
   0x3   :  { %p176_p0 = scmp.ne.s32.totalorder %s19_s14, %s175_s15  ;;  %p181_p2 = scmp.lt.s32.totalorder %s175_s15, %s175_s15 }
   0x5   :  { %p182_p3 = por %p181_p2, %p180_p1 }
   0x7   :  { %p183_p4 = pnand %p182_p3, %p176_p0 }
   0x9   :  { %186 = shalt.err (!%p183_p4)
}
   0xa   :  { %s189_s16 = smov [#allocation3]  }
   0xb   :  { %21 = dma.vmem_to_smem %s19_s14, 16, %s189_s16, [#allocation4]  }
   0xc   :  { %187 = dma.done.wait [#allocation4], 16  }
   0xd   :  { %188 = vsyncadd [#allocation4], 4294967280 }
   0xe   :  { %27 = sfence }
   0xf   :  { %s35_s17 = sld [smem:[#allocation3]]  ;;  %s153_s18 = sld [smem:[#allocation3 + $0x1]]  ;;  %v28_v0 = vld [vmem:[%s239_s2] sm:$0xff]  ;;  %v150_v1 = vld [vmem:[%s239_s2 + $0x8] sm:$0xff]  ;;  %v151_v2 = vld [vmem:[%s239_s2 + $0x10] sm:$0xff]  ;;  %v111_v44 = vlaneseq }
  0x10   :  { %s154_s19 = sld [smem:[#allocation3 + $0x2]]  ;;  %s155_s20 = sld [smem:[#allocation3 + $0x3]]  ;;  %v152_v38 = vld [vmem:[%s239_s2 + $0x18] sm:$0xff] }
  0x11   :  { %s156_s21 = sld [smem:[#allocation3 + $0x4]]  ;;  %s157_s22 = sld [smem:[#allocation3 + $0x5]]  ;;  %v112_v50 = vshrl.u32 %v111_v44, 7  ;;  %v115_v58 = vand.u32 127, %v111_v44 }
  0x12   :  { %s158_s1 = sld [smem:[#allocation3 + $0x6]]  ;;  %s159_s25 = sld [smem:[#allocation3 + $0x7]] }
  0x13   :  { %s160_s26 = sld [smem:[#allocation3 + $0x8]]  ;;  %s222_s4 = sld [smem:[#allocation3 + $0x9]]  ;;  %v113_v57 = vmul.u32 128, %v112_v50 }
  0x14   :  { %s224_s5 = sld [smem:[#allocation3 + $0xa]]  ;;  %s163_s6 = sld [smem:[#allocation3 + $0xb]] }
  0x15   :  { %v36_v3 = vstv %s35_s17  ;;  %v39_v5 = vstv %s153_s18  ;;  %s165_s7 = sld [smem:[#allocation3 + $0xd]]  ;;  %s167_s8 = sld [smem:[#allocation3 + $0xf]]  ;;  %v116_v62 = vadd.s32 %v115_v58, %v113_v57 }
  0x16   :  { %v37_v4 = vmul.f32 %v36_v3, %v28_v0  ;;  %v43_v6 = vstv %s154_s19  ;;  %v40_v7 = vmul.f32 %v150_v1, %v39_v5  ;;  %v48_v9 = vstv %s155_s20  ;;  %s164_s9 = sld [smem:[#allocation3 + $0xc]]  ;;  %s166_s10 = sld [smem:[#allocation3 + $0xe]] }
  0x17   :  { %v44_v8 = vmul.f32 %v151_v2, %v43_v6  ;;  %v51_v10 = vstv %s156_s21  ;;  %v49_v11 = vmul.f32 %v48_v9, %v28_v0  ;;  %v55_v13 = vstv %s157_s22  ;;  %s168_s13 = sld [smem:[#allocation3 + $0x10]]  ;;  %s169_s14 = sld [smem:[#allocation3 + $0x11]] }
  0x18   :  { %v52_v12 = vmul.f32 %v150_v1, %v51_v10  ;;  %v60_v14 = vstv %s158_s1  ;;  %v41_v15 = vadd.f32 %v40_v7, %v37_v4  ;;  %v56_v16 = vmul.f32 %v151_v2, %v55_v13 }
  0x19   :  { %v61_v17 = vmul.f32 %v60_v14, %v28_v0  ;;  %v63_v18 = vstv %s159_s25  ;;  %v67_v21 = vstv %s160_s26  ;;  %v72_v26 = vstv %s222_s4 }
  0x1a   :  { %v53_v19 = vadd.f32 %v52_v12, %v49_v11  ;;  %v64_v20 = vmul.f32 %v150_v1, %v63_v18  ;;  %v45_v22 = vadd.f32 %v44_v8, %v41_v15  ;;  %v68_v23 = vmul.f32 %v151_v2, %v67_v21 }
  0x1b   :  { %v75_v28 = vstv %s224_s5  ;;  %v79_v32 = vstv %s163_s6  ;;  %v88_v39 = vstv %s165_s7  ;;  %v96_v40 = vstv %s167_s8 }
  0x1c   :  { %v57_v24 = vadd.f32 %v56_v16, %v53_v19  ;;  %v65_v25 = vadd.f32 %v64_v20, %v61_v17  ;;  %v46_v27 = vmax.f32 %v45_v22, 0.0  ;;  %v85_v42 = vstv %s164_s9 }
  0x1d   :  { %v93_v43 = vstv %s166_s10  ;;  %v89_v46 = vmul.f32 %v152_v38, %v88_v39  ;;  %v97_v47 = vmul.f32 %v152_v38, %v96_v40  ;;  %v101_v53 = vstv %s168_s13 }
  0x1e   :  { %v58_v29 = vmax.f32 %v57_v24, 0.0  ;;  %v69_v30 = vadd.f32 %v68_v23, %v65_v25  ;;  %v73_v31 = vmul.f32 %v72_v26, %v46_v27  ;;  %v104_v54 = vstv %s169_s14 }
  0x20   :  { %v70_v33 = vmax.f32 %v69_v30, 0.0  ;;  %v76_v34 = vmul.f32 %v75_v28, %v58_v29 }
  0x22   :  { %v77_v35 = vadd.f32 %v76_v34, %v73_v31  ;;  %v80_v36 = vmul.f32 %v79_v32, %v70_v33 }
  0x24   :  { %v81_v37 = vadd.f32 %v80_v36, %v77_v35 }
  0x26   :  { %v82_v41 = vadd.f32 %v81_v37, %v28_v0  ;;  %v117_v0 = vstv %s237_s0 }
  0x27   :  { %vm118_vm0 = vcmp.lt.s32.totalorder %v116_v62, %v117_v0 }
  0x28   :  { %v83_v45 = vmax.f32 %v82_v41, 0.0 }
  0x2a   :  { %v86_v48 = vmul.f32 %v85_v42, %v83_v45  ;;  %v94_v49 = vmul.f32 %v93_v43, %v83_v45 }
  0x2c   :  { %v90_v51 = vadd.f32 %v89_v46, %v86_v48  ;;  %v98_v52 = vadd.f32 %v97_v47, %v94_v49 }
  0x2e   :  { %v91_v55 = vmax.f32 %v90_v51, 0.0  ;;  %v99_v56 = vmax.f32 %v98_v52, 0.0 }
  0x30   :  { %v102_v59 = vmul.f32 %v101_v53, %v91_v55  ;;  %v105_v60 = vmul.f32 %v104_v54, %v99_v56 }
  0x32   :  { %v106_v61 = vadd.f32 %v105_v60, %v102_v59 }
  0x34   :  { %v107_v63 = vadd.f32 %v106_v61, %v83_v45 }
  0x36   :  { %v108_v1 = vmax.f32 %v107_v63, 0.0 }
  0x38   :  { %v109_v2 = vmul.f32 1000.0, %v108_v1 }
  0x3a   :  { %v119_v3 = vsel %vm118_vm0, %v109_v2, -1e+30 }
  0x3b   :  { %120 = vmax.xlane.f32.xlu0 %v119_v3 }
  0xc8   :  { %v121_v4 = vpop.xlane.xlu0 %120 }
  0xc9   :  { %v122_v5 = vrot.slane %v121_v4, 4 }
  0xcb   :  { %v123_v6 = vmax.f32 %v121_v4, %v122_v5 }
  0xcd   :  { %v124_v7 = vrot.slane %v123_v6, 2 }
  0xcf   :  { %v125_v8 = vmax.f32 %v123_v6, %v124_v7 }
  0xd1   :  { %v126_v9 = vrot.slane %v125_v8, 1 }
  0xd3   :  { %v127_v10 = vmax.f32 %v125_v8, %v126_v9 }
  0xd5   :  { %v128_v11 = vsub.f32 %v119_v3, %v127_v10 }
  0xd7   :  { %v129_v12 = vmul.f32 1.442695, %v128_v11 }
  0xd9   :  { %171 = vpow2.f32 %v129_v12 }
  0xe3   :  { %v172_v13 = vpop.eup %171 }
  0xe4   :  { %131 = vadd.xlane.f32.xlu0 %v172_v13 }
 0x171   :  { %v132_v14 = vpop.xlane.xlu0 %131 }
 0x172   :  { %v133_v15 = vrot.slane %v132_v14, 4 }
 0x174   :  { %v134_v16 = vadd.f32 %v133_v15, %v132_v14 }
 0x176   :  { %v135_v17 = vrot.slane %v134_v16, 2 }
 0x178   :  { %v136_v18 = vadd.f32 %v135_v17, %v134_v16 }
 0x17a   :  { %v137_v19 = vrot.slane %v136_v18, 1 }
 0x17c   :  { %v138_v20 = vadd.f32 %v137_v19, %v136_v18 }
 0x17e   :  { %173 = vrcp.f32 %v138_v20 }
 0x188   :  { %v174_v21 = vpop.eup %173 }
 0x189   :  { %v140_v22 = vmul.f32 %v174_v21, %v138_v20 }
 0x18b   :  { %v141_v23 = vsub.f32 2.0, %v140_v22 }
 0x18d   :  { %v142_v24 = vmul.f32 %v174_v21, %v141_v23 }
 0x18f   :  { %v143_v25 = vmul.f32 %v172_v13, %v142_v24 }
 0x191   :  { %144 = vst [vmem:[%s240_s3] sm:$0xff] %v143_v25 }
 0x192   :  { %149 = vsyncpa [#allocation4], 1 }

</bundles_post_ra>
